<compile_context>
chip_gen: v7x
topology: tpu7x:2x2x1
jax: 0.10.0
libtpu: 0.0.40
codegen_flags: <defaults>
</compile_context>

<pallas_src>
import jax
import jax.numpy as jnp
from jax.experimental import pallas as pl
from jax.experimental.pallas import tpu as pltpu


def mlp_kernel(xa_ref, w1a_ref, w2a_ref, w3_ref, b3_ref, o_ref):
    # xa_ref : (4, tn)   bf16  rows = [x, y, z, 1]; points live along lanes.
    # w1a_ref: (72, 4)   bf16  rows 0..63 = [w1 | b1]; row 64 = [0,0,0,1]; rows 65..71 = 0.
    # w2a_ref: (128, 72) bf16  cols 0..63 = w2; col 64 = b2; cols 65..71 = 0.
    # w3_ref : (1, 128)  bf16
    # b3_ref : (1, 1)    f32
    # o_ref  : (1, tn)   f32   lane-dense output slab (unmasked stores).

    # Layer 1 (+ b1 fold): tiny-K matmul on the otherwise idle MXU, f32 accumulation.
    h1 = jnp.dot(w1a_ref[...], xa_ref[...], preferred_element_type=jnp.float32)   # (72, tn)
    h1 = jnp.maximum(h1, 0.0).astype(jnp.bfloat16)   # relu in f32 on VPU, pack to bf16 for MXU
    # row 64 stays exactly 1.0 through relu/bf16; rows 65..71 stay 0.

    # Layer 2 (+ b2 fold via the ones row): the dominant matmul, bf16 operands, f32 accumulate.
    h2 = jnp.dot(w2a_ref[...], h1, preferred_element_type=jnp.float32)            # (128, tn)
    h2 = jnp.maximum(h2, 0.0).astype(jnp.bfloat16)

    # Layer 3 on the MXU: (1,128)@(128,tn) -> lane-dense (1, tn); scalar b3 add; tanh on EUP.
    o = jnp.dot(w3_ref[...], h2, preferred_element_type=jnp.float32) + b3_ref[...]
    o_ref[...] = jnp.tanh(o)


def _hw_budget():
    """Generation-aware (tile cap, vmem_limit_bytes).

    v5e / v6e have 128 MiB VMEM per TensorCore -> 16K-wide tiles and a 64 MiB scoped budget.
    v7x has 64 MiB per TC (32 MiB scoped default) -> stay at 8K / 32 MiB. Falls back to the
    conservative setting if the hardware query is unavailable.
    """
    try:
        info = pltpu.get_tpu_info()
        vmem = getattr(info, "vmem_capacity_bytes", 0) or 0
    except Exception:
        vmem = 0
    if vmem >= 96 * 1024 * 1024:
        return 16384, 64 * 1024 * 1024
    return 8192, 32 * 1024 * 1024


def _choose_tile(n, tile_n):
    # Tile must be a multiple of 128 (lane width of the blocks).
    tile = max(128, (int(tile_n) // 128) * 128)
    # Don't pick a tile far beyond N for small inputs.
    tile = min(tile, pl.cdiv(n, 128) * 128)
    return tile


def _augment_params(params):
    """Fold b1/b2 into bf16 MXU operand matrices (padded to sublane-aligned shapes)."""
    w1, b1, w2, b2, w3, b3 = params
    f32, bf = jnp.float32, jnp.bfloat16

    w1a = jnp.zeros((72, 4), f32)
    w1a = w1a.at[:64, :3].set(w1.astype(f32))
    w1a = w1a.at[:64, 3].set(b1.astype(f32))
    w1a = w1a.at[64, 3].set(1.0)                 # emits the constant-1 row used to fold b2

    w2a = jnp.zeros((128, 72), f32)
    w2a = w2a.at[:, :64].set(w2.astype(f32))
    w2a = w2a.at[:, 64].set(b2.astype(f32))

    w3r = w3.reshape(1, 128).astype(f32)
    b3c = b3.reshape(1, 1).astype(f32)
    return w1a.astype(bf), w2a.astype(bf), w3r.astype(bf), b3c


def implicit_function_forward(point, z, c, params, *, tile_n=None):
    # z, c are unused in the reference forward pass.
    del z, c
    N = point.shape[0]

    max_tile, vmem_limit = _hw_budget()
    if tile_n is None:
        tile_n = max_tile
    tile = _choose_tile(N, min(int(tile_n), max_tile))
    grid_n = pl.cdiv(N, tile)       # ragged last block is masked by Pallas; no jnp.pad pass

    # Feature-major augmented input: rows = [x, y, z, 1], points along lanes, bf16 MXU operand.
    # Single transpose+concat expression so XLA can fuse it into one copy pass.
    xa = jnp.concatenate(
        [point.astype(jnp.bfloat16).T, jnp.ones((1, N), jnp.bfloat16)], axis=0)   # (4, N)

    w1a, w2a, w3r, b3c = _augment_params(params)

    fixed = lambda i: (0, 0)
    out = pl.pallas_call(
        mlp_kernel,
        out_shape=jax.ShapeDtypeStruct((1, N), jnp.float32),
        grid_spec=pltpu.PrefetchScalarGridSpec(
            num_scalar_prefetch=0,
            grid=(grid_n,),
            in_specs=[
                pl.BlockSpec((4, tile), lambda i: (0, i)),   # augmented point^T tile
                pl.BlockSpec((72, 4), fixed),                # [w1 | b1] + ones row
                pl.BlockSpec((128, 72), fixed),              # [w2 | b2]
                pl.BlockSpec((1, 128), fixed),               # w3 row
                pl.BlockSpec((1, 1), fixed),                 # b3
            ],
            out_specs=pl.BlockSpec((1, tile), lambda i: (0, i)),   # lane-dense output slab
        ),
        compiler_params=pltpu.CompilerParams(
            dimension_semantics=("parallel",),
            vmem_limit_bytes=vmem_limit,
        ),
        cost_estimate=pl.CostEstimate(
            flops=int(2 * N * (72 * 4 + 128 * 72 + 128)),
            transcendentals=int(N),
            bytes_accessed=int(N * (4 * 2 + 4)),   # bf16 input + f32 output
        ),
    )(xa, w1a, w2a, w3r, b3c)

    return out[0]                                   # == x.squeeze(1)


def xavier_uniform(key, out_f, in_f):
    # matches torch.nn.init.xavier_uniform_ (gain=1) on a (out_features, in_features) weight.
    limit = (6.0 / (in_f + out_f)) ** 0.5
    return jax.random.uniform(key, (out_f, in_f), jnp.float32, -limit, limit)


def init_params(key):
    k1, k2, k3 = jax.random.split(key, 3)
    w1 = xavier_uniform(k1, 64, 3)
    b1 = jnp.full((64,), 0.1, jnp.float32)
    w2 = xavier_uniform(k2, 128, 64)
    b2 = jnp.full((128,), 0.1, jnp.float32)
    # linear3 has no explicit init in the module; initialize deterministically anyway.
    w3 = xavier_uniform(k3, 1, 128)
    b3 = jnp.full((1,), 0.1, jnp.float32)
    return (w1, b1, w2, b2, w3, b3)


def _matched_reference(point, params):
    """Same math as the kernel: bf16 MXU operands, f32 accumulation, f32 relu/tanh."""
    w1, b1, w2, b2, w3, b3 = params
    bf, f32 = jnp.bfloat16, jnp.float32
    h1 = (jnp.dot(point.astype(bf), w1.astype(bf).T, preferred_element_type=f32)
          + b1.astype(bf).astype(f32))
    h1 = jnp.maximum(h1, 0.0).astype(bf)
    h2 = (jnp.dot(h1, w2.astype(bf).T, preferred_element_type=f32)
          + b2.astype(bf).astype(f32))
    h2 = jnp.maximum(h2, 0.0).astype(bf)
    o = jnp.dot(h2, w3.astype(bf).T, preferred_element_type=f32) + b3.astype(f32)
    return jnp.tanh(o)[:, 0]


def _f32_reference(point, params):
    w1, b1, w2, b2, w3, b3 = params
    h = jnp.maximum(point @ w1.T + b1, 0.0)
    h = jnp.maximum(h @ w2.T + b2, 0.0)
    return jnp.tanh(h @ w3.T + b3)[:, 0]


if __name__ == "__main__":
    key = jax.random.PRNGKey(0)
    kp, kz, kc, kw = jax.random.split(key, 4)

    N = 300  # deliberately not a multiple of 128 to exercise the masked ragged last block
    point = jax.random.normal(kp, (N, 3), jnp.float32)
    z = jax.random.normal(kz, (N, 32), jnp.float32)   # unused by forward
    c = jax.random.normal(kc, (N, 32), jnp.float32)   # unused by forward
    params = init_params(kw)

    out = implicit_function_forward(point, z, c, params)
    jax.block_until_ready(out)
    assert out.shape == (N,)
    assert bool(jnp.all(jnp.isfinite(out)))

    # Precision-matched reference (bf16 operands, f32 accumulation): should agree tightly.
    ref_bf16 = _matched_reference(point, params)
    err_bf16 = float(jnp.max(jnp.abs(out - ref_bf16)))
    assert jnp.allclose(out, ref_bf16, atol=2e-3, rtol=2e-3), err_bf16

    # Loose sanity check against the pure-f32 PyTorch-equivalent math (bf16 MXU operands
    # introduce ~1e-2-level differences by design).
    ref_f32 = _f32_reference(point, params)
    err_f32 = float(jnp.max(jnp.abs(out - ref_f32)))
    assert jnp.allclose(out, ref_f32, atol=1e-1, rtol=1e-1), err_f32

    print("KERNEL_OK")
</pallas_src>

<mosaic_0001>
module attributes {stable_mosaic.version = 11 : i64} {
  func.func @mlp_kernel(%arg0: i32, %arg1: memref<4x384xbf16, #tpu.memory_space<vmem>>, %arg2: memref<72x4xbf16, #tpu.memory_space<vmem>>, %arg3: memref<128x72xbf16, #tpu.memory_space<vmem>>, %arg4: memref<1x128xbf16, #tpu.memory_space<vmem>>, %arg5: memref<1x1xf32, #tpu.memory_space<vmem>>, %arg6: memref<1x384xf32, #tpu.memory_space<vmem>>) attributes {dimension_semantics = [#tpu.dimension_semantics<parallel>], iteration_bounds = array<i64: 1>, scalar_prefetch = 0 : i64, scratch_operands = 0 : i64, tpu.core_type = #tpu.core_type<tc>, window_params = [{transform_indices = @transform_0, window_bounds = array<i64: 4, 384>}, {pipeline_mode = #tpu.pipeline_mode<synchronous>, transform_indices = @transform_1, window_bounds = array<i64: 72, 4>}, {pipeline_mode = #tpu.pipeline_mode<synchronous>, transform_indices = @transform_2, window_bounds = array<i64: 128, 72>}, {pipeline_mode = #tpu.pipeline_mode<synchronous>, transform_indices = @transform_3, window_bounds = array<i64: 1, 128>}, {pipeline_mode = #tpu.pipeline_mode<synchronous>, transform_indices = @transform_4, window_bounds = array<i64: 1, 1>}, {transform_indices = @transform_5, window_bounds = array<i64: 1, 384>}]} {
    %c0 = arith.constant 0 : index
    %c0_0 = arith.constant 0 : index
    %0 = vector.load %arg2[%c0, %c0_0] : memref<72x4xbf16, #tpu.memory_space<vmem>>, vector<72x4xbf16>
    %c0_1 = arith.constant 0 : index
    %c0_2 = arith.constant 0 : index
    %1 = vector.load %arg1[%c0_1, %c0_2] : memref<4x384xbf16, #tpu.memory_space<vmem>>, vector<4x384xbf16>
    %cst = arith.constant dense<0.000000e+00> : vector<72x384xf32>
    %2 = tpu.matmul %0, %1, %cst {dimension_numbers = #tpu.dot_dimension_numbers<[1], [0], [0], [1], [0, 0, 1, 1], [], []>} : vector<72x4xbf16>, vector<4x384xbf16>, vector<72x384xf32> -> vector<72x384xf32>
    %cst_3 = arith.constant 0.000000e+00 : f32
    %3 = vector.broadcast %cst_3 : f32 to vector<72x384xf32>
    %4 = arith.maximumf %2, %3 : vector<72x384xf32>
    %5 = arith.truncf %4 : vector<72x384xf32> to vector<72x384xbf16>
    %c0_4 = arith.constant 0 : index
    %c0_5 = arith.constant 0 : index
    %6 = vector.load %arg3[%c0_4, %c0_5] : memref<128x72xbf16, #tpu.memory_space<vmem>>, vector<128x72xbf16>
    %cst_6 = arith.constant dense<0.000000e+00> : vector<128x384xf32>
    %7 = tpu.matmul %6, %5, %cst_6 {dimension_numbers = #tpu.dot_dimension_numbers<[1], [0], [0], [1], [0, 0, 1, 1], [], []>} : vector<128x72xbf16>, vector<72x384xbf16>, vector<128x384xf32> -> vector<128x384xf32>
    %cst_7 = arith.constant 0.000000e+00 : f32
    %8 = vector.broadcast %cst_7 : f32 to vector<128x384xf32>
    %9 = arith.maximumf %7, %8 : vector<128x384xf32>
    %10 = arith.truncf %9 : vector<128x384xf32> to vector<128x384xbf16>
    %c0_8 = arith.constant 0 : index
    %c0_9 = arith.constant 0 : index
    %11 = vector.load %arg4[%c0_8, %c0_9] : memref<1x128xbf16, #tpu.memory_space<vmem>>, vector<1x128xbf16>
    %cst_10 = arith.constant dense<0.000000e+00> : vector<1x384xf32>
    %12 = tpu.matmul %11, %10, %cst_10 {dimension_numbers = #tpu.dot_dimension_numbers<[1], [0], [0], [1], [0, 0, 1, 1], [], []>} : vector<1x128xbf16>, vector<128x384xbf16>, vector<1x384xf32> -> vector<1x384xf32>
    %c0_11 = arith.constant 0 : index
    %c0_12 = arith.constant 0 : index
    %13 = vector.load %arg5[%c0_11, %c0_12] : memref<1x1xf32, #tpu.memory_space<vmem>>, vector<1x1xf32>
    %14 = vector.broadcast %13 : vector<1x1xf32> to vector<1x384xf32>
    %15 = arith.addf %12, %14 : vector<1x384xf32>
    %16 = math.tanh %15 : vector<1x384xf32>
    %c0_13 = arith.constant 0 : index
    %c0_14 = arith.constant 0 : index
    %17 = vector.load %arg6[%c0_13, %c0_14] : memref<1x384xf32, #tpu.memory_space<vmem>>, vector<1x384xf32>
    tpu.vector_store %arg6[%c0_13, %c0_14], %16 {strides = array<i32>} : memref<1x384xf32, #tpu.memory_space<vmem>>, vector<1x384xf32>,
    return
  }
  func.func @transform_0(%arg0: i32) -> (i32, i32) {
    %c0_i32 = arith.constant 0 : i32
    %c0_i32_0 = arith.constant 0 : i32
    return %c0_i32, %arg0 : i32, i32
  }
  func.func @transform_1(%arg0: i32) -> (i32, i32) {
    %c0_i32 = arith.constant 0 : i32
    %c0_i32_0 = arith.constant 0 : i32
    %c0_i32_1 = arith.constant 0 : i32
    return %c0_i32, %c0_i32_0 : i32, i32
  }
  func.func @transform_2(%arg0: i32) -> (i32, i32) {
    %c0_i32 = arith.constant 0 : i32
    %c0_i32_0 = arith.constant 0 : i32
    %c0_i32_1 = arith.constant 0 : i32
    return %c0_i32, %c0_i32_0 : i32, i32
  }
  func.func @transform_3(%arg0: i32) -> (i32, i32) {
    %c0_i32 = arith.constant 0 : i32
    %c0_i32_0 = arith.constant 0 : i32
    %c0_i32_1 = arith.constant 0 : i32
    return %c0_i32, %c0_i32_0 : i32, i32
  }
  func.func @transform_4(%arg0: i32) -> (i32, i32) {
    %c0_i32 = arith.constant 0 : i32
    %c0_i32_0 = arith.constant 0 : i32
    %c0_i32_1 = arith.constant 0 : i32
    return %c0_i32, %c0_i32_0 : i32, i32
  }
  func.func @transform_5(%arg0: i32) -> (i32, i32) {
    %c0_i32 = arith.constant 0 : i32
    %c0_i32_0 = arith.constant 0 : i32
    return %c0_i32, %arg0 : i32, i32
  }
}

</mosaic_0001>

<bundles_post_ra>
// kernel: tpu_custom_call.1
= control target key start
LH: loop header
LB: loop body
LE: loop exit
PB: predicated region body
PF: predicated region fallthrough
CT: control target
= control target key end

     0   :  { %s1177_s0 = inlined_call_operand.vmem [shape: bf16[4,300], index: 0, kind: input, shape index: {}]   ;;  %s1178_s1 = inlined_call_operand.vmem [shape: bf16[72,4], index: 1, kind: input, shape index: {}]   ;;  %s1179_s2 = inlined_call_operand.vmem [shape: bf16[128,72], index: 2, kind: input, shape index: {}]   ;;  %s1180_s3 = inlined_call_operand.vmem [shape: bf16[1,128], index: 3, kind: input, shape index: {}]   ;;  %s1181_s4 = inlined_call_operand.<no memory space> [shape: f32[1,1], index: 4, kind: input, shape index: {}]   ;;  %s1182_s5 = inlined_call_operand.hbm [shape: f32[1,300], index: 5, kind: output, shape index: {}]  }
   0x1   :  { %v10_v0 = vstv %s1181_s4 }
   0x2   :  { %11 = vst [vmem:[#allocation2] sm:$0x1] %v10_v0 }
   0x3   :  { %v62_v1 = vlaneseq  ;;  %v1000_v2 = vmov 1983009808   ;;  %v1001_v4 = vmov 0   ;;  %v33_v7 = vld [vmem:[%s1177_s0] sm:$0x3f]  ;;  %vm90_vm0 = vcmask 1041408  }
   0x4   :  { %v60_v3 = vunpack.c.l.s4 %v1000_v2  ;;  %132 = vmatprep.mubr.bf16.mxu0 %v1001_v4  ;;  %162 = vmatprep.mubr.bf16.mxu1 %v1001_v4  ;;  %v58_v9 = vcombine.high %v33_v7, %v33_v7  ;;  %v957_v13 = vld [vmem:[%s1178_s1] sm:$0xff]   ;;  %v958_v15 = vld [vmem:[%s1178_s1 + $0x18] sm:$0xff]  }
   0x5   :  { %v1042_v5 = vshrl.u32 %v62_v1, 7  ;;  %955 = vset.pattern.permute.xlu0 %v1001_v4 }
   0x6   :  { %v61_v6 = vunpack.c.0.s8 %v60_v3 }
   0x8   :  { %v64_v8 = vsub.s32 %v61_v6, %v1042_v5 }
   0xa   :  { %v65_v10 = vrot.slane %v33_v7, %v64_v8  ;;  %v72_v14 = vrot.slane %v58_v9, %v64_v8 }
   0xc   :  { %v73_v11 = vcombine.high %v65_v10, %v65_v10  ;;  %v92_v12 = vsel %vm90_vm0, %v65_v10, 0 }
   0xe   :  { %814 = vmatprep.subr.msk.bf16.mxu0 %vm90_vm0, %v73_v11  ;;  %946 = vmatprep.subr.msk.bf16.mxu1 %vm90_vm0, %v73_v11 }
   0xf   :  { %12 = vsyncpa [#allocation4], 0  ;;  %101 = vmatpush1.bf16.msra.mxu0 %v92_v12  ;;  %947 = vmatpush1.bf16.msra.mxu1 %v92_v12  ;;  %vm74_vm1 = vcmask 31744   ;;  %v1002_v16 = vmov 0.0   ;;  %v98_v17 = vsel %vm90_vm0, %v72_v14, 0  ;;  %v959_v18 = vld [vmem:[%s1178_s1 + $0x8] sm:$0xff]  }
  0x10   :  { %878 = vmatprep.subr.bf16.mxu1 %v1002_v16  ;;  %v960_v19 = vld [vmem:[%s1178_s1 + $0x20] ss:$0 sps:$4 sm:$0xff]   ;;  %vm1003_vm2 = vmmov 0   ;;  %v961_v20 = vld [vmem:[%s1178_s1 + $0x10] sm:$0xff]   ;;  %vm351_vm3 = vcmask 588800   ;;  %vm376_vm4 = vcmask 1043456  }
  0x11   :  { %v1096_v21 = vld [vmem:[%s1179_s2] sm:$0xff]   ;;  %vm792_vm5 = vcmp.lt.s32.totalorder %v62_v1, 384 }
  0x12   :  { %815 = vmatmul.mubr.msk.bf16.vlgmr.msra.gmra.mrb[0].mxu0 %vm74_vm1, %v957_v13  ;;  %818 = vmatmul.mubr.msk.bf16.vlgmr.msra.gmra.mrb[0].mxu1 %vm74_vm1, %v958_v15 }
  0x13   :  { %142 = vmatprep.mubr.bf16.mxu0 %v1001_v4  ;;  %172 = vmatprep.mubr.bf16.mxu1 %v1001_v4 }
  0x14   :  { %879 = vmatpush3.bf16.msra.mxu1 %v98_v17 }
  0x1a   :  { %816 = vmatmul.mubr.msk.bf16.gmra.mrb[4].mxu0 %vm74_vm1, %v959_v18  ;;  %819 = vmatmul.mubr.msk.bf16.gmra.mrb[4].mxu1 %vm74_vm1, %v960_v19 }
  0x1b   :  { %152 = vmatprep.mubr.bf16.mxu0 %v1001_v4  ;;  %880 = vmatprep.mubr.msk.bf16.mxu1 %vm1003_vm2, %v1002_v16 }
  0x22   :  { %817 = vmatmul.mubr.msk.bf16.gmra.mrb[8].mxu0 %vm74_vm1, %v961_v20  ;;  %881 = vmatmul.mubr.msk.bf16.vlgmr.msra.gmra.mrb[8].mxu1 %vm74_vm1, %v957_v13 }
  0x23   :  { %884 = vmatprep.mubr.msk.bf16.mxu1 %vm1003_vm2, %v1002_v16  ;;  %418 = vmatprep.mubr.bf16.mxu0 %v1001_v4 }
  0x2a   :  { %885 = vmatmul.mubr.msk.bf16.gmra.mrb[12].mxu1 %vm74_vm1, %v959_v18 }
  0x2b   :  { %888 = vmatprep.mubr.msk.bf16.mxu1 %vm1003_vm2, %v1002_v16 }
  0x32   :  { %889 = vmatmul.mubr.msk.bf16.gmra.mrb[16].mxu1 %vm74_vm1, %v961_v20 }
  0x33   :  { %892 = vmatprep.mubr.msk.bf16.mxu1 %vm1003_vm2, %v1002_v16 }
  0x3a   :  { %893 = vmatmul.mubr.msk.bf16.gmra.mrb[20].mxu1 %vm74_vm1, %v958_v15 }
  0x3b   :  { %896 = vmatprep.mubr.msk.bf16.mxu1 %vm1003_vm2, %v1002_v16 }
  0x42   :  { %897 = vmatmul.mubr.msk.bf16.gmra.mrb[24].mxu1 %vm74_vm1, %v960_v19 }
  0x43   :  { %910 = vmatprep.mubr.msk.bf16.mxu1 %vm351_vm3, %v1096_v21 }
  0xe5   :  { %v164_v22 = vpop.f32.mrb[0].mxu1  ;;  %v134_v23 = vpop.f32.mrb[0].mxu0 }
  0xe6   :  { %v271_v24 = vmax.f32 %v164_v22, 0.0  ;;  %v166_v25 = vpop.f32.mrb[1].mxu1  ;;  %v136_v26 = vpop.f32.mrb[1].mxu0  ;;  %v253_v32 = vmax.f32 %v134_v23, 0.0 }
  0xe7   :  { %v272_v27 = vmax.f32 %v166_v25, 0.0  ;;  %v168_v28 = vpop.f32.mrb[2].mxu1  ;;  %v138_v29 = vpop.f32.mrb[2].mxu0  ;;  %v254_v36 = vmax.f32 %v136_v26, 0.0 }
  0xe8   :  { %v274_v30 = vmax.f32 %v168_v28, 0.0  ;;  %v170_v31 = vpop.f32.mrb[3].mxu1  ;;  %v256_v33 = vmax.f32 %v138_v29, 0.0  ;;  %v140_v34 = vpop.f32.mrb[3].mxu0 }
  0xe9   :  { %v275_v35 = vmax.f32 %v170_v31, 0.0  ;;  %v257_v37 = vmax.f32 %v140_v34, 0.0  ;;  %v963_v34 = vld [vmem:[%s1179_s2 + $0x8] sm:$0xff]  }
  0xea   :  { %v289_v38 = vpack.c.bf16 %v274_v30, %v271_v24  ;;  %v280_v39 = vpack.c.bf16 %v256_v33, %v253_v32 }
  0xeb   :  { %v290_v40 = vpack.c.bf16 %v275_v35, %v272_v27  ;;  %v281_v41 = vpack.c.bf16 %v257_v37, %v254_v36 }
  0xed   :  { %v174_v42 = vpop.f32.mrb[4].mxu1  ;;  %v144_v43 = vpop.f32.mrb[4].mxu0  ;;  %386 = vmatprep.subr.bf16.mxu0 %v281_v41  ;;  %v964_v41 = vld [vmem:[%s1179_s2 + $0x10] sm:$0xff]  }
  0xee   :  { %v176_v44 = vpop.f32.mrb[5].mxu1  ;;  %v146_v45 = vpop.f32.mrb[5].mxu0  ;;  %387 = vmatpush1.bf16.msra.mxu0 %v280_v39  ;;  %v259_v49 = vmax.f32 %v144_v43, 0.0  ;;  %v277_v12 = vmax.f32 %v174_v42, 0.0 }
  0xef   :  { %v178_v46 = vpop.f32.mrb[6].mxu1  ;;  %v148_v47 = vpop.f32.mrb[6].mxu0  ;;  %v260_v52 = vmax.f32 %v146_v45, 0.0  ;;  %v278_v13 = vmax.f32 %v176_v44, 0.0 }
  0xf0   :  { %v179_v48 = vpop.f32.mrb[7].mxu1  ;;  %v262_v50 = vmax.f32 %v148_v47, 0.0  ;;  %v150_v51 = vpop.f32.mrb[7].mxu0  ;;  %v292_v22 = vpack.c.bf16 %v277_v12, %v277_v12 }
  0xf1   :  { %v263_v53 = vmax.f32 %v150_v51, 0.0  ;;  %v293_v23 = vpack.c.bf16 %v278_v13, %v278_v13  ;;  %v965_v48 = vld [vmem:[%s1179_s2 + $0x18] sm:$0xff]   ;;  %v968_v51 = vld [vmem:[%s1179_s2 + $0x30] sm:$0xff]  }
  0xf2   :  { %v283_v54 = vpack.c.bf16 %v262_v50, %v259_v49  ;;  %v378_v25 = vsel %vm376_vm4, %v292_v22, 0  ;;  %v966_v49 = vld [vmem:[%s1179_s2 + $0x20] sm:$0xff]   ;;  %v967_v50 = vld [vmem:[%s1179_s2 + $0x28] sm:$0xff]  }
  0xf3   :  { %v284_v55 = vpack.c.bf16 %v263_v53, %v260_v52  ;;  %v969_v52 = vld [vmem:[%s1179_s2 + $0x38] sm:$0xff]   ;;  %v669_v53 = vld [vmem:[#allocation2] sm:$0x1] }
  0xf4   :  { %672 = vperm.xlu0 %955, %v669_v53  }
  0xf5   :  { %v154_v56 = vpop.f32.mrb[8].mxu0  ;;  %v215_v57 = vpop.f32.mrb[8].mxu1  ;;  %388 = vmatprep.subr.bf16.mxu0 %v284_v55 }
  0xf6   :  { %v255_v58 = vmax.f32 %v215_v57, 0.0  ;;  %v156_v59 = vpop.f32.mrb[9].mxu0  ;;  %v882_v60 = vpop.f32.mrb[9].mxu1  ;;  %389 = vmatpush1.bf16.msra.mxu0 %v283_v54  ;;  %v265_v63 = vmax.f32 %v154_v56, 0.0 }
  0xf7   :  { %v158_v61 = vpop.f32.mrb[10].mxu0  ;;  %v218_v62 = vpop.f32.mrb[10].mxu1  ;;  %v266_v7 = vmax.f32 %v156_v59, 0.0 }
  0xf8   :  { %v268_v0 = vmax.f32 %v158_v61, 0.0  ;;  %v258_v2 = vmax.f32 %v218_v62, 0.0  ;;  %v160_v3 = vpop.f32.mrb[11].mxu0  ;;  %v883_v6 = vpop.f32.mrb[11].mxu1 }
  0xf9   :  { %v269_v8 = vmax.f32 %v160_v3, 0.0 }
  0xfa   :  { %v286_v9 = vpack.c.bf16 %v268_v0, %v265_v63  ;;  %v282_v10 = vpack.c.bf16 %v258_v2, %v255_v58 }
  0xfb   :  { %v287_v11 = vpack.c.bf16 %v269_v8, %v266_v7 }
  0xfc   :  { %900 = vmatprep.subr.bf16.mxu1 %v282_v10 }
  0xfd   :  { %v223_v14 = vpop.f32.mrb[12].mxu1  ;;  %390 = vmatprep.subr.bf16.mxu0 %v287_v11  ;;  %901 = vmatpush3.bf16.msra.mxu1 %v282_v10 }
  0xfe   :  { %v261_v15 = vmax.f32 %v223_v14, 0.0  ;;  %v886_v17 = vpop.f32.mrb[13].mxu1  ;;  %391 = vmatpush1.bf16.msra.mxu0 %v286_v9 }
  0xff   :  { %v226_v18 = vpop.f32.mrb[14].mxu1  ;;  %392 = vmatprep.subr.bf16.mxu0 %v290_v40 }
 0x100   :  { %v264_v19 = vmax.f32 %v226_v18, 0.0  ;;  %v887_v20 = vpop.f32.mrb[15].mxu1 }
 0x102   :  { %v285_v24 = vpack.c.bf16 %v264_v19, %v261_v15  ;;  %393 = vmatpush1.bf16.msra.mxu0 %v289_v38 }
 0x103   :  { %833 = vmatprep.subr.msk.bf16.mxu0 %vm376_vm4, %v293_v23 }
 0x104   :  { %902 = vmatprep.subr.bf16.mxu1 %v285_v24 }
 0x105   :  { %v231_v26 = vpop.f32.mrb[16].mxu1  ;;  %903 = vmatpush3.bf16.msra.mxu1 %v285_v24 }
 0x106   :  { %v267_v27 = vmax.f32 %v231_v26, 0.0  ;;  %v890_v28 = vpop.f32.mrb[17].mxu1  ;;  %395 = vmatpush1.bf16.msra.mxu0 %v378_v25 }
 0x107   :  { %v234_v29 = vpop.f32.mrb[18].mxu1  ;;  %926 = vmatprep.subr.bf16.mxu0 %v1002_v16 }
 0x108   :  { %v270_v30 = vmax.f32 %v234_v29, 0.0  ;;  %v891_v31 = vpop.f32.mrb[19].mxu1 }
 0x109   :  { %834 = vmatmul.mubr.msk.bf16.vlgmr.msra.gmra.mrb[12].mxu0 %vm351_vm3, %v1096_v21 }
 0x10a   :  { %v288_v32 = vpack.c.bf16 %v270_v30, %v267_v27  ;;  %428 = vmatprep.mubr.bf16.mxu0 %v1001_v4 }
 0x10c   :  { %904 = vmatprep.subr.bf16.mxu1 %v288_v32 }
 0x10d   :  { %v239_v33 = vpop.f32.mrb[20].mxu1  ;;  %905 = vmatpush3.bf16.msra.mxu1 %v288_v32 }
 0x10e   :  { %v273_v35 = vmax.f32 %v239_v33, 0.0  ;;  %v894_v36 = vpop.f32.mrb[21].mxu1 }
 0x10f   :  { %v242_v37 = vpop.f32.mrb[22].mxu1 }
 0x110   :  { %v276_v38 = vmax.f32 %v242_v37, 0.0  ;;  %v895_v39 = vpop.f32.mrb[23].mxu1 }
 0x111   :  { %835 = vmatmul.mubr.msk.bf16.gmra.mrb[16].mxu0 %vm351_vm3, %v963_v34 }
 0x112   :  { %v291_v40 = vpack.c.bf16 %v276_v38, %v273_v35  ;;  %438 = vmatprep.mubr.bf16.mxu0 %v1001_v4 }
 0x114   :  { %906 = vmatprep.subr.bf16.mxu1 %v291_v40 }
 0x115   :  { %v247_v21 = vpop.f32.mrb[24].mxu1  ;;  %907 = vmatpush3.bf16.msra.mxu1 %v291_v40 }
 0x116   :  { %v279_v42 = vmax.f32 %v247_v21, 0.0  ;;  %v898_v43 = vpop.f32.mrb[25].mxu1 }
 0x117   :  { %v250_v44 = vpop.f32.mrb[26].mxu1 }
 0x118   :  { %v294_v45 = vpack.c.bf16 %v279_v42, %v279_v42  ;;  %v899_v46 = vpop.f32.mrb[27].mxu1 }
 0x119   :  { %836 = vmatmul.mubr.msk.bf16.gmra.mrb[20].mxu0 %vm351_vm3, %v964_v41 }
 0x11a   :  { %v384_v47 = vsel %vm376_vm4, %v294_v45, 0  ;;  %948 = vmatprep.subr.msk.bf16.mxu1 %vm376_vm4, %v294_v45  ;;  %448 = vmatprep.mubr.bf16.mxu0 %v1001_v4 }
 0x11b   :  { %909 = vmatpush3.bf16.msra.mxu1 %v384_v47 }
 0x11e   :  { %911 = vmatmul.mubr.msk.bf16.vlgmr.msra.gmra.mrb[28].mxu1 %vm351_vm3, %v963_v34 }
 0x11f   :  { %914 = vmatprep.mubr.msk.bf16.mxu1 %vm351_vm3, %v964_v41 }
 0x121   :  { %837 = vmatmul.mubr.msk.bf16.gmra.mrb[24].mxu0 %vm351_vm3, %v965_v48 }
 0x122   :  { %458 = vmatprep.mubr.bf16.mxu0 %v1001_v4 }
 0x126   :  { %915 = vmatmul.mubr.msk.bf16.gmra.mrb[32].mxu1 %vm351_vm3, %v965_v48 }
 0x127   :  { %918 = vmatprep.mubr.msk.bf16.mxu1 %vm351_vm3, %v966_v49 }
 0x129   :  { %838 = vmatmul.mubr.msk.bf16.gmra.mrb[28].mxu0 %vm351_vm3, %v966_v49 }
 0x12a   :  { %468 = vmatprep.mubr.bf16.mxu0 %v1001_v4 }
 0x12e   :  { %919 = vmatmul.mubr.msk.bf16.gmra.mrb[36].mxu1 %vm351_vm3, %v967_v50 }
 0x12f   :  { %922 = vmatprep.mubr.msk.bf16.mxu1 %vm351_vm3, %v968_v51 }
 0x131   :  { %839 = vmatmul.mubr.msk.bf16.gmra.mrb[32].mxu0 %vm351_vm3, %v967_v50 }
 0x132   :  { %478 = vmatprep.mubr.bf16.mxu0 %v1001_v4 }
 0x136   :  { %923 = vmatmul.mubr.msk.bf16.gmra.mrb[40].mxu1 %vm351_vm3, %v969_v52 }
 0x137   :  { %711 = vmatprep.mubr.bf16.mxu1 %v1001_v4 }
 0x139   :  { %840 = vmatmul.mubr.msk.bf16.gmra.mrb[36].mxu0 %vm351_vm3, %v968_v51 }
 0x13a   :  { %488 = vmatprep.mubr.bf16.mxu0 %v1001_v4 }
 0x141   :  { %841 = vmatmul.mubr.msk.bf16.gmra.mrb[40].mxu0 %vm351_vm3, %v969_v52 }
 0x142   :  { %942 = vmatprep.mubr.msk.bf16.mxu0 %vm1003_vm2, %v1002_v16 }
 0x1dc   :  { %v420_v54 = vpop.f32.mrb[12].mxu0 }
 0x1dd   :  { %v422_v55 = vpop.f32.mrb[13].mxu0  ;;  %v596_v57 = vmax.f32 %v420_v54, 0.0 }
 0x1de   :  { %v424_v56 = vpop.f32.mrb[14].mxu0  ;;  %v597_v60 = vmax.f32 %v422_v55, 0.0 }
 0x1df   :  { %v599_v58 = vmax.f32 %v424_v56, 0.0  ;;  %v426_v59 = vpop.f32.mrb[15].mxu0 }
 0x1e0   :  { %v600_v61 = vmax.f32 %v426_v59, 0.0 }
 0x1e1   :  { %v644_v62 = vpack.c.bf16 %v599_v58, %v596_v57 }
 0x1e2   :  { %v645_v63 = vpack.c.bf16 %v600_v61, %v597_v60 }
 0x1e4   :  { %v430_v0 = vpop.f32.mrb[16].mxu0  ;;  %679 = vmatprep.subr.bf16.mxu1 %v645_v63 }
 0x1e5   :  { %v432_v4 = vpop.f32.mrb[17].mxu0  ;;  %680 = vmatpush1.bf16.msra.mxu1 %v644_v62  ;;  %v602_v3 = vmax.f32 %v430_v0, 0.0 }
 0x1e6   :  { %v434_v2 = vpop.f32.mrb[18].mxu0  ;;  %v603_v8 = vmax.f32 %v432_v4, 0.0 }
 0x1e7   :  { %v605_v6 = vmax.f32 %v434_v2, 0.0  ;;  %v436_v7 = vpop.f32.mrb[19].mxu0 }
 0x1e8   :  { %v606_v9 = vmax.f32 %v436_v7, 0.0 }
 0x1e9   :  { %v647_v10 = vpack.c.bf16 %v605_v6, %v602_v3 }
 0x1ea   :  { %v648_v11 = vpack.c.bf16 %v606_v9, %v603_v8 }
 0x1ec   :  { %v440_v12 = vpop.f32.mrb[20].mxu0  ;;  %681 = vmatprep.subr.bf16.mxu1 %v648_v11 }
 0x1ed   :  { %v442_v13 = vpop.f32.mrb[21].mxu0  ;;  %682 = vmatpush1.bf16.msra.mxu1 %v647_v10  ;;  %v608_v15 = vmax.f32 %v440_v12, 0.0 }
 0x1ee   :  { %v444_v14 = vpop.f32.mrb[22].mxu0  ;;  %v609_v19 = vmax.f32 %v442_v13, 0.0 }
 0x1ef   :  { %v611_v17 = vmax.f32 %v444_v14, 0.0  ;;  %v446_v18 = vpop.f32.mrb[23].mxu0 }
 0x1f0   :  { %v612_v20 = vmax.f32 %v446_v18, 0.0 }
 0x1f1   :  { %v912_v22 = vpop.f32.mrb[28].mxu1  ;;  %v650_v23 = vpack.c.bf16 %v611_v17, %v608_v15 }
 0x1f2   :  { %v604_v24 = vmax.f32 %v912_v22, 0.0  ;;  %v533_v25 = vpop.f32.mrb[29].mxu1  ;;  %v651_v26 = vpack.c.bf16 %v612_v20, %v609_v19 }
 0x1f3   :  { %v598_v27 = vmax.f32 %v533_v25, 0.0  ;;  %v913_v28 = vpop.f32.mrb[30].mxu1 }
 0x1f4   :  { %v607_v29 = vmax.f32 %v913_v28, 0.0  ;;  %v536_v30 = vpop.f32.mrb[31].mxu1  ;;  %v450_v31 = vpop.f32.mrb[24].mxu0  ;;  %683 = vmatprep.subr.bf16.mxu1 %v651_v26 }
 0x1f5   :  { %v601_v32 = vmax.f32 %v536_v30, 0.0  ;;  %v452_v33 = vpop.f32.mrb[25].mxu0  ;;  %684 = vmatpush1.bf16.msra.mxu1 %v650_v23  ;;  %v614_v37 = vmax.f32 %v450_v31, 0.0 }
 0x1f6   :  { %v649_v34 = vpack.c.bf16 %v607_v29, %v604_v24  ;;  %v454_v35 = vpop.f32.mrb[26].mxu0  ;;  %v615_v40 = vmax.f32 %v452_v33, 0.0 }
 0x1f7   :  { %v646_v36 = vpack.c.bf16 %v601_v32, %v598_v27  ;;  %v617_v38 = vmax.f32 %v454_v35, 0.0  ;;  %v456_v39 = vpop.f32.mrb[27].mxu0 }
 0x1f8   :  { %v618_v21 = vmax.f32 %v456_v39, 0.0 }
 0x1f9   :  { %927 = vmatpush3.bf16.msra.mxu0 %v646_v36  ;;  %v916_v41 = vpop.f32.mrb[32].mxu1  ;;  %v653_v42 = vpack.c.bf16 %v617_v38, %v614_v37 }
 0x1fa   :  { %v616_v43 = vmax.f32 %v916_v41, 0.0  ;;  %v549_v44 = vpop.f32.mrb[33].mxu1  ;;  %928 = vmatprep.subr.bf16.mxu0 %v1002_v16  ;;  %v654_v45 = vpack.c.bf16 %v618_v21, %v615_v40 }
 0x1fb   :  { %v610_v46 = vmax.f32 %v549_v44, 0.0  ;;  %v917_v47 = vpop.f32.mrb[34].mxu1  ;;  %v668_v44 = vld [vmem:[%s1180_s3] sm:$0x1]  ;;  %s1005_s3 = smov [#allocation3]  }
 0x1fc   :  { %v619_v48 = vmax.f32 %v917_v47, 0.0  ;;  %v552_v49 = vpop.f32.mrb[35].mxu1  ;;  %v460_v50 = vpop.f32.mrb[28].mxu0  ;;  %685 = vmatprep.subr.bf16.mxu1 %v654_v45  ;;  %s801_s21 = sshll.u32 %s1005_s3, 4  ;;  %s802_s21 = int_to_ptr.vmem [resolvable:$true] %s801_s21 }
 0x1fd   :  { %v613_v51 = vmax.f32 %v552_v49, 0.0  ;;  %929 = vmatpush3.bf16.msra.mxu0 %v649_v34  ;;  %v462_v52 = vpop.f32.mrb[29].mxu0  ;;  %686 = vmatpush1.bf16.msra.mxu1 %v653_v42  ;;  %v620_v56 = vmax.f32 %v460_v50, 0.0  ;;  %s976_s4 = scalar_lea.vmem %s802_s21, 48  ;;  %s980_s22 = scalar_lea.vmem %s802_s21, 64 }
 0x1fe   :  { %v655_v53 = vpack.c.bf16 %v619_v48, %v616_v43  ;;  %930 = vmatprep.subr.bf16.mxu0 %v1002_v16  ;;  %v464_v54 = vpop.f32.mrb[30].mxu0  ;;  %v621_v59 = vmax.f32 %v462_v52, 0.0  ;;  %p977_p0 = scmp.ne.s32.totalorder %s802_s21, %s976_s4  ;;  %p981_p1 = scmp.lt.s32.totalorder %s802_s21, %s802_s21 }
 0x1ff   :  { %v652_v55 = vpack.c.bf16 %v613_v51, %v610_v46  ;;  %v623_v57 = vmax.f32 %v464_v54, 0.0  ;;  %v466_v58 = vpop.f32.mrb[31].mxu0  ;;  %p982_p2 = scmp.lt.s32.totalorder %s980_s22, %s976_s4 }
 0x200   :  { %v624_v60 = vmax.f32 %v466_v58, 0.0 }
 0x201   :  { %931 = vmatpush3.bf16.msra.mxu0 %v652_v55  ;;  %v920_v61 = vpop.f32.mrb[36].mxu1  ;;  %v656_v62 = vpack.c.bf16 %v623_v57, %v620_v56  ;;  %p983_p3 = por %p982_p2, %p981_p1 }
 0x202   :  { %932 = vmatprep.subr.bf16.mxu0 %v1002_v16  ;;  %v628_v63 = vmax.f32 %v920_v61, 0.0  ;;  %v565_v0 = vpop.f32.mrb[37].mxu1  ;;  %v657_v4 = vpack.c.bf16 %v624_v60, %v621_v59 }
 0x203   :  { %v622_v2 = vmax.f32 %v565_v0, 0.0  ;;  %v921_v3 = vpop.f32.mrb[38].mxu1  ;;  %p984_p4 = pnand %p983_p3, %p977_p0 }
 0x204   :  { %v631_v6 = vmax.f32 %v921_v3, 0.0  ;;  %v568_v7 = vpop.f32.mrb[39].mxu1  ;;  %v470_v8 = vpop.f32.mrb[32].mxu0  ;;  %687 = vmatprep.subr.bf16.mxu1 %v657_v4 }
 0x205   :  { %933 = vmatpush3.bf16.msra.mxu0 %v655_v53  ;;  %v625_v9 = vmax.f32 %v568_v7, 0.0  ;;  %v472_v10 = vpop.f32.mrb[33].mxu0  ;;  %688 = vmatpush1.bf16.msra.mxu1 %v656_v62  ;;  %v626_v14 = vmax.f32 %v470_v8, 0.0  ;;  %v673_v53 = vpop.permute.xlu0 %672 }
 0x206   :  { %v661_v11 = vpack.c.bf16 %v631_v6, %v628_v63  ;;  %934 = vmatprep.subr.bf16.mxu0 %v1002_v16  ;;  %v474_v12 = vpop.f32.mrb[34].mxu0  ;;  %v627_v18 = vmax.f32 %v472_v10, 0.0 }
 0x207   :  { %v658_v13 = vpack.c.bf16 %v625_v9, %v622_v2  ;;  %v629_v15 = vmax.f32 %v474_v12, 0.0  ;;  %v476_v17 = vpop.f32.mrb[35].mxu0  ;;  %v1004_v2 = vmov 1966171168  }
 0x208   :  { %v630_v19 = vmax.f32 %v476_v17, 0.0  ;;  %v768_v3 = vunpack.c.l.s4 %v1004_v2 }
 0x209   :  { %935 = vmatpush3.bf16.msra.mxu0 %v658_v13  ;;  %v659_v20 = vpack.c.bf16 %v629_v15, %v626_v14  ;;  %v924_v22 = vpop.f32.mrb[40].mxu1 }
 0x20a   :  { %936 = vmatprep.subr.bf16.mxu0 %v1002_v16  ;;  %v660_v23 = vpack.c.bf16 %v630_v19, %v627_v18  ;;  %v640_v24 = vmax.f32 %v924_v22, 0.0  ;;  %v581_v25 = vpop.f32.mrb[41].mxu1  ;;  %v769_v6 = vunpack.c.0.s8 %v768_v3 }
 0x20b   :  { %v634_v26 = vmax.f32 %v581_v25, 0.0  ;;  %v925_v27 = vpop.f32.mrb[42].mxu1 }
 0x20c   :  { %v643_v28 = vmax.f32 %v925_v27, 0.0  ;;  %v480_v29 = vpop.f32.mrb[36].mxu0  ;;  %v584_v30 = vpop.f32.mrb[43].mxu1  ;;  %689 = vmatprep.subr.bf16.mxu1 %v660_v23  ;;  %v772_v9 = vsub.s32 %v769_v6, %v1042_v5 }
 0x20d   :  { %937 = vmatpush3.bf16.msra.mxu0 %v661_v11  ;;  %v637_v31 = vmax.f32 %v584_v30, 0.0  ;;  %v482_v32 = vpop.f32.mrb[37].mxu0  ;;  %690 = vmatpush1.bf16.msra.mxu1 %v659_v20  ;;  %v632_v35 = vmax.f32 %v480_v29, 0.0 }
 0x20e   :  { %v667_v33 = vpack.c.bf16 %v643_v28, %v640_v24  ;;  %v484_v34 = vpop.f32.mrb[38].mxu0  ;;  %938 = vmatprep.subr.bf16.mxu0 %v1002_v16  ;;  %v633_v39 = vmax.f32 %v482_v32, 0.0 }
 0x20f   :  { %v664_v36 = vpack.c.bf16 %v637_v31, %v634_v26  ;;  %v635_v37 = vmax.f32 %v484_v34, 0.0  ;;  %v486_v38 = vpop.f32.mrb[39].mxu0 }
 0x210   :  { %v636_v40 = vmax.f32 %v486_v38, 0.0 }
 0x211   :  { %v662_v21 = vpack.c.bf16 %v635_v37, %v632_v35  ;;  %939 = vmatpush3.bf16.msra.mxu0 %v664_v36 }
 0x212   :  { %v663_v41 = vpack.c.bf16 %v636_v40, %v633_v39  ;;  %940 = vmatprep.subr.bf16.mxu0 %v1002_v16  ;;  %v677_v16 = vsub.s32 0, %v1042_v5 }
 0x214   :  { %v490_v42 = vpop.f32.mrb[40].mxu0  ;;  %691 = vmatprep.subr.bf16.mxu1 %v663_v41  ;;  %v678_v56 = vrot.slane %v673_v53, %v677_v16 }
 0x215   :  { %v492_v43 = vpop.f32.mrb[41].mxu0  ;;  %692 = vmatpush1.bf16.msra.mxu1 %v662_v21  ;;  %941 = vmatpush3.bf16.msra.mxu0 %v667_v33  ;;  %v638_v46 = vmax.f32 %v490_v42, 0.0 }
 0x216   :  { %v494_v45 = vpop.f32.mrb[42].mxu0  ;;  %v639_v49 = vmax.f32 %v492_v43, 0.0 }
 0x217   :  { %v641_v47 = vmax.f32 %v494_v45, 0.0  ;;  %v496_v48 = vpop.f32.mrb[43].mxu0 }
 0x218   :  { %v642_v50 = vmax.f32 %v496_v48, 0.0  ;;  %943 = vmatmul.mubr.bf16.vlgmr.msra.gmra.mrb[44].mxu0 %v668_v44 }
 0x219   :  { %v665_v51 = vpack.c.bf16 %v641_v47, %v638_v46 }
 0x21a   :  { %v666_v52 = vpack.c.bf16 %v642_v50, %v639_v49 }
 0x21c   :  { %693 = vmatprep.subr.bf16.mxu1 %v666_v52 }
 0x21d   :  { %694 = vmatpush1.bf16.msra.mxu1 %v665_v51 }
 0x220   :  { %712 = vmatmul.mubr.bf16.vlgmr.msra.gmra.mrb[44].mxu1 %v668_v44 }
 0x2eb   :  { %v754_v54 = vpop.f32.mrb[44].mxu0 }
 0x2ec   :  { %v944_v55 = vpop.f32.mrb[45].mxu0  ;;  %v755_v59 = vadd.f32 %v754_v54, %v678_v56 }
 0x2ed   :  { %v757_v57 = vpop.f32.mrb[46].mxu0 }
 0x2ee   :  { %v945_v58 = vpop.f32.mrb[47].mxu0  ;;  %970 = vtanh.f32 %v755_v59 }
 0x2f3   :  { %v713_v60 = vpop.f32.mrb[44].mxu1 }
 0x2f4   :  { %v714_v61 = vadd.f32 %v713_v60, %v678_v56  ;;  %v715_v62 = vpop.f32.mrb[45].mxu1 }
 0x2f5   :  { %v716_v63 = vadd.f32 %v715_v62, %v678_v56  ;;  %v717_v0 = vpop.f32.mrb[46].mxu1 }
 0x2f6   :  { %972 = vtanh.f32 %v714_v61  ;;  %v718_v4 = vpop.f32.mrb[47].mxu1 }
 0x2f7   :  { %974 = vtanh.f32 %v716_v63 }
 0x2f8   :  { %v971_v7 = vpop.eup %970 }
 0x2f9   :  { %v780_v13 = vrot.slane %v971_v7, %v772_v9 }
 0x300   :  { %v973_v8 = vpop.eup %972 }
 0x301   :  { %v975_v10 = vpop.eup %974 }
 0x302   :  { %v766_v11 = vcombine.low %v973_v8, %v975_v10 }
 0x304   :  { %v773_v12 = vrot.slane %v766_v11, %v772_v9 }
 0x306   :  { %v781_v14 = vcombine.low %v773_v12, %v780_v13 }
 0x308   :  { %v788_v15 = vrot.slane %v781_v14, %v772_v9 }
 0x30a   :  { %794 = vst.msk [vmem:[#allocation3] sm:$0x7] %vm792_vm5, %v788_v15 }
 0x30b   :  { %987 = shalt.err (!%p984_p4)
}
 0x30c   :  { %s988_s0 = scalar_lea.hbm %s1182_s5, 48 }
 0x30d   :  { %p989_p5 = scmp.ne.s32.totalorder %s1182_s5, %s988_s0  ;;  %p992_p6 = scmp.lt.u32.totalorder %s988_s0, %s1182_s5 }
 0x30f   :  { %p994_p7 = pnand %p992_p6, %p989_p5 }
 0x311   :  { %997 = shalt.err (!%p994_p7)
}
 0x312   :  { %804 = dma.vmem_to_hbm [thread:$0]  %s802_s21, 48, %s1182_s5, [#allocation4]  }
 0x313   :  { %998 = dma.done.wait [#allocation4], 48  }
 0x314   :  { %999 = vsyncadd [#allocation4], 4294967248 }
 0x315   :  { %808 = vsyncpa [#allocation4], 1 }

</bundles_post_ra>
